<compile_context>
chip_gen: v7x
topology: tpu7x:2x2x1
jax: 0.10.0
libtpu: 0.0.40
codegen_flags: <defaults>
</compile_context>

<pallas_src>
import jax
import jax.numpy as jnp
from jax.experimental import pallas as pl
from jax.experimental.pallas import tpu as pltpu

F_PAD = 64          # 50 real features, zero-padded to a lane-friendly width
H1, H2 = 512, 256   # fc1 / fc2 widths


def _round_up(x, m):
    return ((x + m - 1) // m) * m


def _auto_tiling():
    """(default batch tile, vmem limit) picked by chip VMEM capacity."""
    try:
        cap = getattr(pltpu.get_tpu_info(), "vmem_capacity_bytes", 64 << 20)
    except Exception:
        cap = 64 << 20
    if cap >= (100 << 20):            # v5e / v6e: 128 MiB physical VMEM
        return 4096, 64 << 20
    return 2048, 32 << 20             # v7x: 64 MiB physical VMEM


def _mlp_kernel(x_ref, fe_ref, w1_ref, b1_ref, w2_ref, b2_ref, w3_ref, b3_ref,
                out3_ref, fc2_ref):
    # x_ref : (bt, 8)  f32  packed columns [x1, x2, x3(float), x4, x5, 0, 0, 0]
    # fe_ref: (8, 64)  f32  rows = [w_vqa | w_r1 | w_m | w_i | fe-bias | emb0..2]
    # w1: (64, 512) bf16   w2: (512, 256) bf16   w3: (1, 256) f32
    # b1/b2: (1, H) f32    b3: (1, 1) f32 (SMEM scalar)
    xk = x_ref[...]
    fe = fe_ref[...]

    # ---- fused front-end: rank-1 broadcasts (VPU) + embedding selects ----
    h = (xk[:, 0:1] * fe[0:1, :]          # layer1_VQA -> cols 0:20
         + xk[:, 1:2] * fe[1:2, :]        # layer1_R1  -> cols 20:25
         + xk[:, 3:4] * fe[2:3, :]        # layer1_M   -> cols 30:40
         + xk[:, 4:5] * fe[3:4, :]        # layer1_I   -> cols 40:50
         + fe[4:5, :])                    # packed front-end biases
    x3f = xk[:, 2:3]                      # embedding index as float (0., 1., 2.)
    h = h + jnp.where(x3f < 0.5, fe[5:6, :],
                      jnp.where(x3f < 1.5, fe[6:7, :], fe[7:8, :]))

    # ---- fc1 + ReLU (bf16 MXU operands, f32 accumulate) ----
    z1 = jnp.dot(h.astype(jnp.bfloat16), w1_ref[...],
                 preferred_element_type=jnp.float32) + b1_ref[...]
    z1 = jnp.maximum(z1, 0.0)
    # TODO(synk): F.dropout(p=0.5) omitted -- eval/inference semantics (identity).

    # ---- fc2 + ReLU ----
    z2 = jnp.dot(z1.astype(jnp.bfloat16), w2_ref[...],
                 preferred_element_type=jnp.float32) + b2_ref[...]
    z2 = jnp.maximum(z2, 0.0)
    fc2_ref[...] = z2.astype(jnp.bfloat16)   # bf16 writeback: halves HBM traffic

    # ---- fc3 (256 -> 1): VPU multiply + XLU lane reduction (f32 z2) ----
    out3_ref[...] = (jnp.sum(z2 * w3_ref[...], axis=-1, keepdims=True)
                     + b3_ref[0, 0])


def _prepare_kernel_params(params):
    """Pack weights into the kernel-friendly (padded / bf16) layout."""
    # (8, 64) front-end pack: rank-1 weights scattered to their h column ranges.
    fe = jnp.zeros((8, F_PAD), jnp.float32)
    fe = fe.at[0, 0:20].set(params["w_vqa"][0])     # layer1_VQA weights
    fe = fe.at[1, 20:25].set(params["w_r1"][0])     # layer1_R1 weights
    fe = fe.at[2, 30:40].set(params["w_m"][0])      # layer1_M weights
    fe = fe.at[3, 40:50].set(params["w_i"][0])      # layer1_I weights
    fe = fe.at[4, 0:20].set(params["b_vqa"][0])     # front-end biases
    fe = fe.at[4, 20:25].set(params["b_r1"][0])
    fe = fe.at[4, 30:40].set(params["b_m"][0])
    fe = fe.at[4, 40:50].set(params["b_i"][0])
    fe = fe.at[5, 25:30].set(params["emb"][0])      # embedding rows -> cols 25:30
    fe = fe.at[6, 25:30].set(params["emb"][1])
    fe = fe.at[7, 25:30].set(params["emb"][2])

    w1_pad = jnp.zeros((F_PAD, H1), jnp.float32).at[:50, :].set(params["w1"])
    return dict(
        fe=fe,                                     # (8, 64)   f32
        w1=w1_pad.astype(jnp.bfloat16),            # (64, 512) bf16
        b1=params["b1"],                           # (1, 512)  f32
        w2=params["w2"].astype(jnp.bfloat16),      # (512, 256) bf16
        b2=params["b2"],                           # (1, 256)  f32
        w3_row=params["w3"].T,                     # (1, 256)  f32
        b3=params["b3"],                           # (1, 1)    f32 -> SMEM
    )


def hybrid_streaming_forward(params, x1, x2, x3, x4, x5, *, block_b=None):
    """Mirrors HybridStreaming.forward (eval mode). Returns (h, fc2[bf16])."""
    auto_bt, vmem_limit = _auto_tiling()
    if block_b is None:
        block_b = auto_bt

    B = x1.shape[0]
    # ---- pack the raw scalar inputs into one (B, 8) f32 array ----
    x3f = x3.reshape(-1, 1).astype(jnp.float32)
    packed = jnp.concatenate(
        [x1, x2, x3f, x4, x5, jnp.zeros((B, 3), jnp.float32)], axis=1)

    # ---- batch tiling (sublane-aligned, ragged last block) ----
    b8 = _round_up(B, 8)
    if b8 != B:
        packed = jnp.pad(packed, ((0, b8 - B), (0, 0)))
    bt = min(block_b, b8)
    if bt == b8 and b8 >= 16:
        # split so the "parallel" batch grid has >= 2 steps (v7x 2-TC sharding)
        bt = _round_up((b8 + 1) // 2, 8)
    num_tiles = pl.cdiv(b8, bt)

    kp = _prepare_kernel_params(params)

    grid_spec = pltpu.PrefetchScalarGridSpec(
        num_scalar_prefetch=0,
        grid=(num_tiles,),
        in_specs=[
            pl.BlockSpec((bt, 8),     lambda i: (i, 0)),   # packed x (pipelined)
            pl.BlockSpec((8, F_PAD),  lambda i: (0, 0)),   # front-end pack
            pl.BlockSpec((F_PAD, H1), lambda i: (0, 0)),   # w1 (VMEM-resident)
            pl.BlockSpec((1, H1),     lambda i: (0, 0)),   # b1
            pl.BlockSpec((H1, H2),    lambda i: (0, 0)),   # w2
            pl.BlockSpec((1, H2),     lambda i: (0, 0)),   # b2
            pl.BlockSpec((1, H2),     lambda i: (0, 0)),   # w3 row
            pl.BlockSpec(memory_space=pltpu.MemorySpace.SMEM),  # b3 scalar
        ],
        out_specs=(
            pl.BlockSpec((bt, 1),  lambda i: (i, 0)),      # fc3 output (f32)
            pl.BlockSpec((bt, H2), lambda i: (i, 0)),      # fc2 output (bf16)
        ),
    )

    out3, fc2 = pl.pallas_call(
        _mlp_kernel,
        out_shape=(jax.ShapeDtypeStruct((b8, 1), jnp.float32),
                   jax.ShapeDtypeStruct((b8, H2), jnp.bfloat16)),
        grid_spec=grid_spec,
        compiler_params=pltpu.CompilerParams(
            dimension_semantics=("parallel",),   # batch axis -> TC sharding on v7x
            vmem_limit_bytes=vmem_limit,
        ),
    )(packed, kp["fe"], kp["w1"], kp["b1"], kp["w2"], kp["b2"],
      kp["w3_row"], kp["b3"])

    return out3[:B], fc2[:B]


def init_params(key):
    """Deterministic PyTorch-style (uniform +/-1/sqrt(fan_in)) initialization."""
    def lin(k, fin, fout):
        kw, kb = jax.random.split(k)
        bound = 1.0 / (fin ** 0.5)
        w = jax.random.uniform(kw, (fin, fout), jnp.float32, -bound, bound)
        b = jax.random.uniform(kb, (1, fout), jnp.float32, -bound, bound)
        return w, b

    keys = jax.random.split(key, 7)
    p = {}
    p["w_vqa"], p["b_vqa"] = lin(keys[0], 1, 20)     # layer1_VQA
    p["w_r1"],  p["b_r1"]  = lin(keys[1], 1, 5)      # layer1_R1
    p["emb"] = jax.random.normal(keys[2], (3, 5), jnp.float32)  # layer1_R2
    p["w_m"],  p["b_m"]  = lin(keys[3], 1, 10)       # layer1_M
    p["w_i"],  p["b_i"]  = lin(keys[4], 1, 10)       # layer1_I
    p["w1"], p["b1"] = lin(keys[5], 50, 512)         # fc1
    k6a, k6b = jax.random.split(keys[6])
    p["w2"], p["b2"] = lin(k6a, 512, 256)            # fc2
    p["w3"], p["b3"] = lin(k6b, 256, 1)              # fc3
    return p


def _reference(params, x1, x2, x3, x4, x5):
    """Pure-JAX f32 reference mirroring the PyTorch module (eval mode)."""
    vqa = x1 @ params["w_vqa"] + params["b_vqa"]
    r1  = x2 @ params["w_r1"]  + params["b_r1"]
    r2  = params["emb"][x3.reshape(-1)]
    m   = x4 @ params["w_m"]   + params["b_m"]
    i_  = x5 @ params["w_i"]   + params["b_i"]
    h = jnp.concatenate([vqa, r1, r2, m, i_], axis=1)
    z1 = jax.nn.relu(h @ params["w1"] + params["b1"])
    z2 = jax.nn.relu(z1 @ params["w2"] + params["b2"])
    return z2 @ params["w3"] + params["b3"], z2


def _make_inputs(key, B):
    k1, k2, k3, k4, k5 = jax.random.split(key, 5)
    x1 = jax.random.normal(k1, (B, 1), jnp.float32)          # VQA score
    x2 = jax.random.normal(k2, (B, 1), jnp.float32)          # R1
    x3 = jax.random.randint(k3, (B,), 0, 3, jnp.int32)       # R2 category (0..2)
    x4 = jax.random.normal(k4, (B, 1), jnp.float32)          # M
    x5 = jax.random.normal(k5, (B, 1), jnp.float32)          # I
    return x1, x2, x3, x4, x5


if __name__ == "__main__":
    key = jax.random.PRNGKey(0)
    kp_, kx_small, kx_big = jax.random.split(key, 3)
    params = init_params(kp_)

    # bf16 MXU operands + bf16 fc2 writeback => loosened tolerance vs f32 ref
    ATOL = RTOL = 2e-2

    # ---- small-batch check (single tile) ----
    B = 8
    xs = _make_inputs(kx_small, B)
    h_out, fc2_out = hybrid_streaming_forward(params, *xs)
    jax.block_until_ready((h_out, fc2_out))
    h_ref, fc2_ref = _reference(params, *xs)
    assert h_out.shape == (B, 1) and fc2_out.shape == (B, 256)
    assert jnp.allclose(h_out, h_ref, atol=ATOL, rtol=RTOL)
    assert jnp.allclose(fc2_out.astype(jnp.float32), fc2_ref, atol=ATOL, rtol=RTOL)

    # ---- default tiling check (2 ragged "parallel" tiles) ----
    B2 = 200
    xs2 = _make_inputs(kx_big, B2)
    h2, fc22 = hybrid_streaming_forward(params, *xs2)
    jax.block_until_ready((h2, fc22))
    h2_ref, fc22_ref = _reference(params, *xs2)
    assert h2.shape == (B2, 1) and fc22.shape == (B2, 256)
    assert jnp.allclose(h2, h2_ref, atol=ATOL, rtol=RTOL)
    assert jnp.allclose(fc22.astype(jnp.float32), fc22_ref, atol=ATOL, rtol=RTOL)

    # ---- forced small-tile check (4 tiles, ragged last block, pipelining) ----
    h3, fc23 = hybrid_streaming_forward(params, *xs2, block_b=64)
    jax.block_until_ready((h3, fc23))
    assert jnp.allclose(h3, h2_ref, atol=ATOL, rtol=RTOL)
    assert jnp.allclose(fc23.astype(jnp.float32), fc22_ref, atol=ATOL, rtol=RTOL)

    print("KERNEL_OK")
</pallas_src>

<mosaic_0001>
module attributes {stable_mosaic.version = 11 : i64} {
  func.func @_mlp_kernel(%arg0: i32, %arg1: memref<8x8xf32, #tpu.memory_space<vmem>>, %arg2: memref<8x64xf32, #tpu.memory_space<vmem>>, %arg3: memref<64x512xbf16, #tpu.memory_space<vmem>>, %arg4: memref<1x512xf32, #tpu.memory_space<vmem>>, %arg5: memref<512x256xbf16, #tpu.memory_space<vmem>>, %arg6: memref<1x256xf32, #tpu.memory_space<vmem>>, %arg7: memref<1x256xf32, #tpu.memory_space<vmem>>, %arg8: memref<1x1xf32, #tpu.memory_space<smem>>, %arg9: memref<8x1xf32, #tpu.memory_space<vmem>>, %arg10: memref<8x256xbf16, #tpu.memory_space<vmem>>) attributes {dimension_semantics = [#tpu.dimension_semantics<parallel>], iteration_bounds = array<i64: 1>, scalar_prefetch = 0 : i64, scratch_operands = 0 : i64, tpu.core_type = #tpu.core_type<tc>, window_params = [{transform_indices = @transform_0, window_bounds = array<i64: 8, 8>}, {pipeline_mode = #tpu.pipeline_mode<synchronous>, transform_indices = @transform_1, window_bounds = array<i64: 8, 64>}, {pipeline_mode = #tpu.pipeline_mode<synchronous>, transform_indices = @transform_2, window_bounds = array<i64: 64, 512>}, {pipeline_mode = #tpu.pipeline_mode<synchronous>, transform_indices = @transform_3, window_bounds = array<i64: 1, 512>}, {pipeline_mode = #tpu.pipeline_mode<synchronous>, transform_indices = @transform_4, window_bounds = array<i64: 512, 256>}, {pipeline_mode = #tpu.pipeline_mode<synchronous>, transform_indices = @transform_5, window_bounds = array<i64: 1, 256>}, {pipeline_mode = #tpu.pipeline_mode<synchronous>, transform_indices = @transform_6, window_bounds = array<i64: 1, 256>}, {transform_indices = @transform_7, window_bounds = array<i64: 1, 1>}, {transform_indices = @transform_8, window_bounds = array<i64: 8, 1>}, {transform_indices = @transform_9, window_bounds = array<i64: 8, 256>}]} {
    %c0 = arith.constant 0 : index
    %c0_0 = arith.constant 0 : index
    %0 = vector.load %arg1[%c0, %c0_0] : memref<8x8xf32, #tpu.memory_space<vmem>>, vector<8x8xf32>
    %c0_1 = arith.constant 0 : index
    %c0_2 = arith.constant 0 : index
    %1 = vector.load %arg2[%c0_1, %c0_2] : memref<8x64xf32, #tpu.memory_space<vmem>>, vector<8x64xf32>
    %2 = vector.extract_strided_slice %0 {offsets = [0, 0], sizes = [8, 1], strides = [1, 1]} : vector<8x8xf32> to vector<8x1xf32>
    %3 = vector.extract_strided_slice %1 {offsets = [0, 0], sizes = [1, 64], strides = [1, 1]} : vector<8x64xf32> to vector<1x64xf32>
    %4 = vector.broadcast %2 : vector<8x1xf32> to vector<8x64xf32>
    %5 = vector.broadcast %3 : vector<1x64xf32> to vector<8x64xf32>
    %6 = arith.mulf %4, %5 : vector<8x64xf32>
    %7 = vector.extract_strided_slice %0 {offsets = [0, 1], sizes = [8, 1], strides = [1, 1]} : vector<8x8xf32> to vector<8x1xf32>
    %8 = vector.extract_strided_slice %1 {offsets = [1, 0], sizes = [1, 64], strides = [1, 1]} : vector<8x64xf32> to vector<1x64xf32>
    %9 = vector.broadcast %7 : vector<8x1xf32> to vector<8x64xf32>
    %10 = vector.broadcast %8 : vector<1x64xf32> to vector<8x64xf32>
    %11 = arith.mulf %9, %10 : vector<8x64xf32>
    %12 = arith.addf %6, %11 : vector<8x64xf32>
    %13 = vector.extract_strided_slice %0 {offsets = [0, 3], sizes = [8, 1], strides = [1, 1]} : vector<8x8xf32> to vector<8x1xf32>
    %14 = vector.extract_strided_slice %1 {offsets = [2, 0], sizes = [1, 64], strides = [1, 1]} : vector<8x64xf32> to vector<1x64xf32>
    %15 = vector.broadcast %13 : vector<8x1xf32> to vector<8x64xf32>
    %16 = vector.broadcast %14 : vector<1x64xf32> to vector<8x64xf32>
    %17 = arith.mulf %15, %16 : vector<8x64xf32>
    %18 = arith.addf %12, %17 : vector<8x64xf32>
    %19 = vector.extract_strided_slice %0 {offsets = [0, 4], sizes = [8, 1], strides = [1, 1]} : vector<8x8xf32> to vector<8x1xf32>
    %20 = vector.extract_strided_slice %1 {offsets = [3, 0], sizes = [1, 64], strides = [1, 1]} : vector<8x64xf32> to vector<1x64xf32>
    %21 = vector.broadcast %19 : vector<8x1xf32> to vector<8x64xf32>
    %22 = vector.broadcast %20 : vector<1x64xf32> to vector<8x64xf32>
    %23 = arith.mulf %21, %22 : vector<8x64xf32>
    %24 = arith.addf %18, %23 : vector<8x64xf32>
    %25 = vector.extract_strided_slice %1 {offsets = [4, 0], sizes = [1, 64], strides = [1, 1]} : vector<8x64xf32> to vector<1x64xf32>
    %26 = vector.broadcast %25 : vector<1x64xf32> to vector<8x64xf32>
    %27 = arith.addf %24, %26 : vector<8x64xf32>
    %28 = vector.extract_strided_slice %0 {offsets = [0, 2], sizes = [8, 1], strides = [1, 1]} : vector<8x8xf32> to vector<8x1xf32>
    %cst = arith.constant 5.000000e-01 : f32
    %29 = vector.broadcast %cst : f32 to vector<8x1xf32>
    %30 = arith.cmpf olt, %28, %29 : vector<8x1xf32>
    %31 = vector.extract_strided_slice %1 {offsets = [5, 0], sizes = [1, 64], strides = [1, 1]} : vector<8x64xf32> to vector<1x64xf32>
    %cst_3 = arith.constant 1.500000e+00 : f32
    %32 = vector.broadcast %cst_3 : f32 to vector<8x1xf32>
    %33 = arith.cmpf olt, %28, %32 : vector<8x1xf32>
    %34 = vector.extract_strided_slice %1 {offsets = [6, 0], sizes = [1, 64], strides = [1, 1]} : vector<8x64xf32> to vector<1x64xf32>
    %35 = vector.extract_strided_slice %1 {offsets = [7, 0], sizes = [1, 64], strides = [1, 1]} : vector<8x64xf32> to vector<1x64xf32>
    %36 = vector.shape_cast %33 : vector<8x1xi1> to vector<8x1xi1>
    %37 = vector.broadcast %36 : vector<8x1xi1> to vector<8x64xi1>
    %38 = vector.shape_cast %34 : vector<1x64xf32> to vector<1x64xf32>
    %39 = vector.broadcast %38 : vector<1x64xf32> to vector<8x64xf32>
    %40 = vector.shape_cast %35 : vector<1x64xf32> to vector<1x64xf32>
    %41 = vector.broadcast %40 : vector<1x64xf32> to vector<8x64xf32>
    %42 = arith.select %37, %39, %41 : vector<8x64xi1>, vector<8x64xf32>
    %43 = vector.shape_cast %30 : vector<8x1xi1> to vector<8x1xi1>
    %44 = vector.broadcast %43 : vector<8x1xi1> to vector<8x64xi1>
    %45 = vector.shape_cast %31 : vector<1x64xf32> to vector<1x64xf32>
    %46 = vector.broadcast %45 : vector<1x64xf32> to vector<8x64xf32>
    %47 = arith.select %44, %46, %42 : vector<8x64xi1>, vector<8x64xf32>
    %48 = arith.addf %27, %47 : vector<8x64xf32>
    %49 = arith.truncf %48 : vector<8x64xf32> to vector<8x64xbf16>
    %c0_4 = arith.constant 0 : index
    %c0_5 = arith.constant 0 : index
    %50 = vector.load %arg3[%c0_4, %c0_5] : memref<64x512xbf16, #tpu.memory_space<vmem>>, vector<64x512xbf16>
    %cst_6 = arith.constant dense<0.000000e+00> : vector<8x512xf32>
    %51 = tpu.matmul %49, %50, %cst_6 {dimension_numbers = #tpu.dot_dimension_numbers<[1], [0], [0], [1], [0, 0, 1, 1], [], []>} : vector<8x64xbf16>, vector<64x512xbf16>, vector<8x512xf32> -> vector<8x512xf32>
    %c0_7 = arith.constant 0 : index
    %c0_8 = arith.constant 0 : index
    %52 = vector.load %arg4[%c0_7, %c0_8] : memref<1x512xf32, #tpu.memory_space<vmem>>, vector<1x512xf32>
    %53 = vector.broadcast %52 : vector<1x512xf32> to vector<8x512xf32>
    %54 = arith.addf %51, %53 : vector<8x512xf32>
    %cst_9 = arith.constant 0.000000e+00 : f32
    %55 = vector.broadcast %cst_9 : f32 to vector<8x512xf32>
    %56 = arith.maximumf %54, %55 : vector<8x512xf32>
    %57 = arith.truncf %56 : vector<8x512xf32> to vector<8x512xbf16>
    %c0_10 = arith.constant 0 : index
    %c0_11 = arith.constant 0 : index
    %58 = vector.load %arg5[%c0_10, %c0_11] : memref<512x256xbf16, #tpu.memory_space<vmem>>, vector<512x256xbf16>
    %cst_12 = arith.constant dense<0.000000e+00> : vector<8x256xf32>
    %59 = tpu.matmul %57, %58, %cst_12 {dimension_numbers = #tpu.dot_dimension_numbers<[1], [0], [0], [1], [0, 0, 1, 1], [], []>} : vector<8x512xbf16>, vector<512x256xbf16>, vector<8x256xf32> -> vector<8x256xf32>
    %c0_13 = arith.constant 0 : index
    %c0_14 = arith.constant 0 : index
    %60 = vector.load %arg6[%c0_13, %c0_14] : memref<1x256xf32, #tpu.memory_space<vmem>>, vector<1x256xf32>
    %61 = vector.broadcast %60 : vector<1x256xf32> to vector<8x256xf32>
    %62 = arith.addf %59, %61 : vector<8x256xf32>
    %cst_15 = arith.constant 0.000000e+00 : f32
    %63 = vector.broadcast %cst_15 : f32 to vector<8x256xf32>
    %64 = arith.maximumf %62, %63 : vector<8x256xf32>
    %65 = arith.truncf %64 : vector<8x256xf32> to vector<8x256xbf16>
    %c0_16 = arith.constant 0 : index
    %c0_17 = arith.constant 0 : index
    %66 = vector.load %arg10[%c0_16, %c0_17] : memref<8x256xbf16, #tpu.memory_space<vmem>>, vector<8x256xbf16>
    tpu.vector_store %arg10[%c0_16, %c0_17], %65 {strides = array<i32>} : memref<8x256xbf16, #tpu.memory_space<vmem>>, vector<8x256xbf16>,
    %c0_18 = arith.constant 0 : index
    %c0_19 = arith.constant 0 : index
    %67 = vector.load %arg7[%c0_18, %c0_19] : memref<1x256xf32, #tpu.memory_space<vmem>>, vector<1x256xf32>
    %68 = vector.broadcast %67 : vector<1x256xf32> to vector<8x256xf32>
    %69 = arith.mulf %64, %68 : vector<8x256xf32>
    %cst_20 = arith.constant dense<0.000000e+00> : vector<8xf32>
    %70 = vector.multi_reduction <add>, %69, %cst_20 [1] : vector<8x256xf32> to vector<8xf32>
    %71 = vector.shape_cast %70 : vector<8xf32> to vector<8x1xf32>
    %c0_21 = arith.constant 0 : index
    %c0_22 = arith.constant 0 : index
    %72 = memref.load %arg8[%c0_21, %c0_22] : memref<1x1xf32, #tpu.memory_space<smem>>
    %73 = vector.broadcast %72 : f32 to vector<8x1xf32>
    %74 = arith.addf %71, %73 : vector<8x1xf32>
    %c0_23 = arith.constant 0 : index
    %c0_24 = arith.constant 0 : index
    %75 = vector.load %arg9[%c0_23, %c0_24] : memref<8x1xf32, #tpu.memory_space<vmem>>, vector<8x1xf32>
    tpu.vector_store %arg9[%c0_23, %c0_24], %74 {strides = array<i32>} : memref<8x1xf32, #tpu.memory_space<vmem>>, vector<8x1xf32>,
    return
  }
  func.func @transform_0(%arg0: i32) -> (i32, i32) {
    %c0_i32 = arith.constant 0 : i32
    %c0_i32_0 = arith.constant 0 : i32
    return %arg0, %c0_i32 : i32, i32
  }
  func.func @transform_1(%arg0: i32) -> (i32, i32) {
    %c0_i32 = arith.constant 0 : i32
    %c0_i32_0 = arith.constant 0 : i32
    %c0_i32_1 = arith.constant 0 : i32
    return %c0_i32, %c0_i32_0 : i32, i32
  }
  func.func @transform_2(%arg0: i32) -> (i32, i32) {
    %c0_i32 = arith.constant 0 : i32
    %c0_i32_0 = arith.constant 0 : i32
    %c0_i32_1 = arith.constant 0 : i32
    return %c0_i32, %c0_i32_0 : i32, i32
  }
  func.func @transform_3(%arg0: i32) -> (i32, i32) {
    %c0_i32 = arith.constant 0 : i32
    %c0_i32_0 = arith.constant 0 : i32
    %c0_i32_1 = arith.constant 0 : i32
    return %c0_i32, %c0_i32_0 : i32, i32
  }
  func.func @transform_4(%arg0: i32) -> (i32, i32) {
    %c0_i32 = arith.constant 0 : i32
    %c0_i32_0 = arith.constant 0 : i32
    %c0_i32_1 = arith.constant 0 : i32
    return %c0_i32, %c0_i32_0 : i32, i32
  }
  func.func @transform_5(%arg0: i32) -> (i32, i32) {
    %c0_i32 = arith.constant 0 : i32
    %c0_i32_0 = arith.constant 0 : i32
    %c0_i32_1 = arith.constant 0 : i32
    return %c0_i32, %c0_i32_0 : i32, i32
  }
  func.func @transform_6(%arg0: i32) -> (i32, i32) {
    %c0_i32 = arith.constant 0 : i32
    %c0_i32_0 = arith.constant 0 : i32
    %c0_i32_1 = arith.constant 0 : i32
    return %c0_i32, %c0_i32_0 : i32, i32
  }
  func.func @transform_7(%arg0: i32) -> (i32, i32) {
    %c0_i32 = arith.constant 0 : i32
    %c0_i32_0 = arith.constant 0 : i32
    %c0_i32_1 = arith.constant 0 : i32
    return %c0_i32, %c0_i32_0 : i32, i32
  }
  func.func @transform_8(%arg0: i32) -> (i32, i32) {
    %c0_i32 = arith.constant 0 : i32
    %c0_i32_0 = arith.constant 0 : i32
    return %arg0, %c0_i32 : i32, i32
  }
  func.func @transform_9(%arg0: i32) -> (i32, i32) {
    %c0_i32 = arith.constant 0 : i32
    %c0_i32_0 = arith.constant 0 : i32
    return %arg0, %c0_i32 : i32, i32
  }
}

</mosaic_0001>

<bundles_post_ra>
// kernel: tpu_custom_call.1
= control target key start
LH: loop header
LB: loop body
LE: loop exit
PB: predicated region body
PF: predicated region fallthrough
CT: control target
= control target key end

     0   :  { %16 = vsyncpa [#allocation4], 0  ;;  %s1419_s0 = inlined_call_operand.hbm [shape: f32[8,8], index: 0, kind: input, shape index: {}]   ;;  %s1420_s1 = inlined_call_operand.hbm [shape: f32[8,64], index: 1, kind: input, shape index: {}]   ;;  %s1421_s2 = inlined_call_operand.hbm [shape: bf16[64,512], index: 2, kind: input, shape index: {}]   ;;  %s1422_s3 = inlined_call_operand.vmem [shape: f32[1,512], index: 3, kind: input, shape index: {}]   ;;  %s1423_s4 = inlined_call_operand.hbm [shape: bf16[512,256], index: 4, kind: input, shape index: {}]   ;;  %s1424_s5 = inlined_call_operand.vmem [shape: f32[1,256], index: 5, kind: input, shape index: {}]   ;;  %s1425_s6 = inlined_call_operand.vmem [shape: f32[1,256], index: 6, kind: input, shape index: {}]   ;;  %s1426_s7 = inlined_call_operand.<no memory space> [shape: f32[1,1], index: 7, kind: input, shape index: {}]   ;;  %s1427_s8 = inlined_call_operand.vmem [shape: f32[8,1], index: 8, kind: output, shape index: {0}]   ;;  %s1428_s9 = inlined_call_operand.hbm [shape: bf16[8,256], index: 9, kind: output, shape index: {1}]  }
   0x1   :  { %17 = vsyncpa [#allocation7], 0 }
   0x2   :  { %18 = vsyncpa [#allocation10], 0 }
   0x3   :  { %19 = vsyncpa [#allocation5], 0  ;;  %s1250_s30 = smov [#allocation6]   ;;  %s1251_s11 = smov [#allocation3]  }
   0x4   :  { %s36_s10 = sshll.u32 %s1250_s30, 4  ;;  %s26_s12 = sshll.u32 %s1251_s11, 4  ;;  %s37_s10 = int_to_ptr.vmem [resolvable:$true] %s36_s10  ;;  %s27_s12 = int_to_ptr.vmem [resolvable:$true] %s26_s12 }
   0x5   :  { %s1132_s15 = scalar_lea.hbm %s1420_s1, 128 }
   0x6   :  { %p1133_p0 = scmp.ne.s32.totalorder %s1420_s1, %s1132_s15  ;;  %p1136_p1 = scmp.lt.u32.totalorder %s1132_s15, %s1420_s1 }
   0x8   :  { %p1138_p2 = pnand %p1136_p1, %p1133_p0 }
   0xa   :  { %1141 = shalt.err (!%p1138_p2)
}
   0xb   :  { %s1142_s20 = scalar_lea.vmem %s37_s10, 128  ;;  %p1147_p4 = scmp.lt.s32.totalorder %s37_s10, %s37_s10 }
   0xc   :  { %p1143_p3 = scmp.ne.s32.totalorder %s37_s10, %s1142_s20  ;;  %p1148_p5 = scmp.lt.s32.totalorder %s1142_s20, %s1142_s20 }
   0xe   :  { %p1149_p6 = por %p1148_p5, %p1147_p4 }
  0x10   :  { %p1150_p7 = pnand %p1149_p6, %p1143_p3 }
  0x12   :  { %1153 = shalt.err (!%p1150_p7)
}
  0x13   :  { %39 = dma.hbm_to_vmem [thread:$0]  %s1420_s1, 128, %s37_s10, [#allocation7]  }
  0x14   :  { %s1154_s25 = scalar_lea.hbm %s1419_s0, 128 }
  0x15   :  { %p1155_p8 = scmp.ne.s32.totalorder %s1419_s0, %s1154_s25  ;;  %p1158_p9 = scmp.lt.u32.totalorder %s1154_s25, %s1419_s0 }
  0x17   :  { %p1160_p10 = pnand %p1158_p9, %p1155_p8 }
  0x19   :  { %1163 = shalt.err (!%p1160_p10)
}
  0x1a   :  { %s1164_s30 = scalar_lea.vmem %s27_s12, 128  ;;  %p1169_p12 = scmp.lt.s32.totalorder %s27_s12, %s27_s12 }
  0x1b   :  { %p1165_p11 = scmp.ne.s32.totalorder %s27_s12, %s1164_s30  ;;  %p1170_p13 = scmp.lt.s32.totalorder %s1164_s30, %s1164_s30 }
  0x1d   :  { %p1171_p0 = por %p1170_p13, %p1169_p12 }
  0x1f   :  { %p1172_p1 = pnand %p1171_p0, %p1165_p11 }
  0x21   :  { %1175 = shalt.err (!%p1172_p1)
}
  0x22   :  { %29 = dma.hbm_to_vmem [thread:$0]  %s1419_s0, 128, %s27_s12, [#allocation4]  }
  0x23   :  { %s1252_s11 = smov [#allocation8]   ;;  %s1176_s16 = scalar_lea.hbm %s1421_s2, 2048 }
  0x24   :  { %s45_s13 = sshll.u32 %s1252_s11, 4  ;;  %p1177_p2 = scmp.ne.s32.totalorder %s1421_s2, %s1176_s16  ;;  %s46_s13 = int_to_ptr.vmem [resolvable:$true] %s45_s13 }
  0x25   :  { %p1180_p3 = scmp.lt.u32.totalorder %s1176_s16, %s1421_s2 }
  0x27   :  { %p1182_p4 = pnand %p1180_p3, %p1177_p2 }
  0x29   :  { %1185 = shalt.err (!%p1182_p4)
}
  0x2a   :  { %s1186_s21 = scalar_lea.vmem %s46_s13, 2048  ;;  %p1191_p6 = scmp.lt.s32.totalorder %s46_s13, %s46_s13 }
  0x2b   :  { %p1187_p5 = scmp.ne.s32.totalorder %s46_s13, %s1186_s21  ;;  %p1192_p7 = scmp.lt.s32.totalorder %s1186_s21, %s1186_s21 }
  0x2d   :  { %p1193_p8 = por %p1192_p7, %p1191_p6 }
  0x2f   :  { %p1194_p9 = pnand %p1193_p8, %p1187_p5 }
  0x31   :  { %1197 = shalt.err (!%p1194_p9)
}
  0x32   :  { %s1253_s0 = smov 256   ;;  %s1254_s12 = smov 16  }
  0x33   :  { %51 = dma.hbm_to_vmem [thread:$0]  %s1421_s2, 2048, %s46_s13, [#allocation7], %s1253_s0, %s1253_s0, %s1254_s12  }
  0x34   :  { %s1255_s24 = smov [#allocation9]   ;;  %s1198_s28 = scalar_lea.hbm %s1423_s4, 8192 }
  0x35   :  { %s59_s25 = sshll.u32 %s1255_s24, 4  ;;  %p1199_p10 = scmp.ne.s32.totalorder %s1423_s4, %s1198_s28  ;;  %s60_s25 = int_to_ptr.vmem [resolvable:$true] %s59_s25 }
  0x36   :  { %p1202_p11 = scmp.lt.u32.totalorder %s1198_s28, %s1423_s4 }
  0x38   :  { %p1204_p12 = pnand %p1202_p11, %p1199_p10 }
  0x3a   :  { %1207 = shalt.err (!%p1204_p12)
}
  0x3b   :  { %s1208_s11 = scalar_lea.vmem %s60_s25, 8192  ;;  %p1213_p0 = scmp.lt.s32.totalorder %s60_s25, %s60_s25 }
  0x3c   :  { %p1209_p13 = scmp.ne.s32.totalorder %s60_s25, %s1208_s11  ;;  %p1214_p1 = scmp.lt.s32.totalorder %s1208_s11, %s1208_s11 }
  0x3e   :  { %p1215_p2 = por %p1214_p1, %p1213_p0 }
  0x40   :  { %p1216_p3 = pnand %p1215_p2, %p1209_p13 }
  0x42   :  { %1219 = shalt.err (!%p1216_p3)
}
  0x43   :  { %s1256_s2 = smov 128   ;;  %s1257_s13 = smov 8  }
  0x44   :  { %65 = dma.hbm_to_vmem [thread:$0]  %s1423_s4, 8192, %s60_s25, [#allocation10], %s1256_s2, %s1256_s2, %s1257_s13  }
  0x45   :  { %1242 = dma.done.wait [#allocation4], 128  }
  0x46   :  { %1243 = vsyncadd [#allocation4], 4294967168 }
  0x47   :  { %1244 = dma.done.wait [#allocation7], 2176  }
  0x48   :  { %1245 = vsyncadd [#allocation7], 4294965120 }
  0x49   :  { %1246 = dma.done.wait [#allocation10], 8192  }
  0x4a   :  { %1247 = vsyncadd [#allocation10], 4294959104  ;;  %v1258_v0 = vmov 0   ;;  %v1259_v1 = vmov 3   ;;  %v85_v2 = vld [vmem:[#allocation3] sm:$0xff]  ;;  %v1260_v7 = vmov 1   ;;  %v92_v26 = vlaneseq }
  0x4b   :  { %1006 = vset.pattern.permute.xlu0 %v1258_v0  ;;  %1008 = vset.pattern.permute.xlu1 %v1259_v1  ;;  %v1012_v3 = vld [vmem:[#allocation8 + $0x4] ss:$16 sps:$4 sm:$0xff]   ;;  %v1014_v4 = vld [vmem:[#allocation8 + $0xc] ss:$16 sps:$4 sm:$0xff]   ;;  %v1016_v5 = vld [vmem:[#allocation8] ss:$16 sps:$4 sm:$0xff]  }
  0x4c   :  { %314 = vmatprep.mubr.bf16.mxu0 %v1258_v0  ;;  %355 = vmatprep.mubr.bf16.mxu1 %v1258_v0  ;;  %v1017_v6 = vld [vmem:[#allocation8 + $0x8] ss:$16 sps:$4 sm:$0xff]   ;;  %v1261_v8 = vmov 4   ;;  %vm133_vm0 = vcmp.lt.f32.partialorder %v85_v2, 1.5  ;;  %vm132_vm1 = vcmp.lt.f32.partialorder %v85_v2, 0.5  ;;  %v1262_v15 = vmov 2  }
  0x4d   :  { %89 = vperm.xlu0 %1006, %v85_v2   ;;  %108 = vperm.xlu1 %1008, %v85_v2   ;;  %v1018_v9 = vld [vmem:[#allocation8 + $0x24] ss:$16 sps:$4 sm:$0xff]   ;;  %v1020_v10 = vld [vmem:[#allocation8 + $0x2c] ss:$16 sps:$4 sm:$0xff]   ;;  %v1022_v11 = vld [vmem:[#allocation8 + $0x20] ss:$16 sps:$4 sm:$0xff]  }
  0x4e   :  { %282 = vmatprep.subr.bf16.mxu0 %v1012_v3  ;;  %323 = vmatprep.subr.bf16.mxu1 %v1014_v4  ;;  %v1023_v12 = vld [vmem:[#allocation8 + $0x28] ss:$16 sps:$4 sm:$0xff]   ;;  %v134_v13 = vsel %vm133_vm0, 1, %v1258_v0  ;;  %v148_v14 = vsel %vm132_vm1, 1, %v1258_v0  ;;  %v1024_v16 = vld [vmem:[#allocation8 + $0x44] ss:$16 sps:$4 sm:$0xff]  }
  0x4f   :  { %283 = vmatpush1.bf16.msra.mxu0 %v1016_v5  ;;  %324 = vmatpush1.bf16.msra.mxu1 %v1017_v6  ;;  %v1026_v17 = vld [vmem:[#allocation8 + $0x4c] ss:$16 sps:$4 sm:$0xff]   ;;  %v1028_v18 = vld [vmem:[#allocation8 + $0x40] ss:$16 sps:$4 sm:$0xff]   ;;  %v1029_v19 = vld [vmem:[#allocation8 + $0x48] ss:$16 sps:$4 sm:$0xff]  }
  0x50   :  { %284 = vmatprep.subr.bf16.mxu0 %v1018_v9  ;;  %325 = vmatprep.subr.bf16.mxu1 %v1020_v10  ;;  %v1030_v20 = vld [vmem:[#allocation8 + $0x64] ss:$16 sps:$4 sm:$0xff]   ;;  %v1032_v21 = vld [vmem:[#allocation8 + $0x6c] ss:$16 sps:$4 sm:$0xff]   ;;  %v1034_v22 = vld [vmem:[#allocation8 + $0x60] ss:$16 sps:$4 sm:$0xff]  }
  0x51   :  { %1007 = vset.pattern.permute.xlu0 %v1260_v7  ;;  %1009 = vset.pattern.permute.xlu1 %v1261_v8  ;;  %v1035_v23 = vld [vmem:[#allocation8 + $0x68] ss:$16 sps:$4 sm:$0xff]   ;;  %v1038_v24 = vld [vmem:[#allocation9 + $0x4] ss:$8 sps:$4 sm:$0xff]   ;;  %v1362_v27 = vshrl.u32 %v92_v26, 7  ;;  %vm278_vm4 = vcmask 523264  }
  0x52   :  { %98 = vperm.xlu0 %1007, %v85_v2   ;;  %118 = vperm.xlu1 %1009, %v85_v2   ;;  %v1041_v25 = vld [vmem:[#allocation9 + $0x104] ss:$8 sps:$4 sm:$0xff]   ;;  %v86_v30 = vld [vmem:[#allocation6] sm:$0xff]  ;;  %v1036_v62 = vld [vmem:[#allocation9] ss:$8 sps:$4 sm:$0xff]  }
  0x53   :  { %285 = vmatpush1.bf16.msra.mxu0 %v1022_v11  ;;  %326 = vmatpush1.bf16.msra.mxu1 %v1023_v12  ;;  %v1365_v28 = vsub.s32 0, %v1362_v27  ;;  %v1368_v29 = vsub.s32 1, %v1362_v27  ;;  %v113_v32 = vsub.s32 2, %v1362_v27  ;;  %v123_v36 = vsub.s32 3, %v1362_v27  ;;  %v1039_v63 = vld [vmem:[#allocation9 + $0x100] ss:$8 sps:$4 sm:$0xff]  }
  0x54   :  { %286 = vmatprep.subr.bf16.mxu0 %v1024_v16  ;;  %327 = vmatprep.subr.bf16.mxu1 %v1026_v17  ;;  %v141_v38 = vsub.s32 6, %v1362_v27  ;;  %v145_v39 = vsub.s32 7, %v1362_v27  ;;  %v155_v42 = vsub.s32 5, %v1362_v27  ;;  %v129_v46 = vsub.s32 4, %v1362_v27  ;;  %v1044_v1 = vld [vmem:[#allocation9 + $0x14] ss:$8 sps:$4 sm:$0xff]  }
  0x55   :  { %v95_v34 = vrot.slane %v86_v30, %v1365_v28  ;;  %v104_v35 = vrot.slane %v86_v30, %v1368_v29  ;;  %v114_v37 = vrot.slane %v86_v30, %v113_v32  ;;  %v124_v45 = vrot.slane %v86_v30, %v123_v36  ;;  %v1047_v2 = vld [vmem:[#allocation9 + $0x114] ss:$8 sps:$4 sm:$0xff]   ;;  %v1042_v3 = vld [vmem:[#allocation9 + $0x10] ss:$8 sps:$4 sm:$0xff]   ;;  %v1050_v5 = vld [vmem:[#allocation9 + $0x24] ss:$8 sps:$4 sm:$0xff]  }
  0x56   :  { %1010 = vset.pattern.permute.xlu1 %v1262_v15  ;;  %1011 = vset.pattern.permute.xlu0 %v1262_v15  ;;  %v142_v49 = vrot.slane %v86_v30, %v141_v38  ;;  %v146_v50 = vrot.slane %v86_v30, %v145_v39  ;;  %v156_v51 = vrot.slane %v86_v30, %v155_v42  ;;  %v1045_v4 = vld [vmem:[#allocation9 + $0x110] ss:$8 sps:$4 sm:$0xff]   ;;  %v1053_v6 = vld [vmem:[#allocation9 + $0x124] ss:$8 sps:$4 sm:$0xff]   ;;  %v1048_v7 = vld [vmem:[#allocation9 + $0x20] ss:$8 sps:$4 sm:$0xff]  }
  0x57   :  { %136 = vperm.xlu1 %1010, %v134_v13   ;;  %150 = vperm.xlu0 %1011, %v148_v14   ;;  %v130_v52 = vrot.slane %v86_v30, %v129_v46  ;;  %v1051_v8 = vld [vmem:[#allocation9 + $0x120] ss:$8 sps:$4 sm:$0xff]   ;;  %v1056_v9 = vld [vmem:[#allocation9 + $0x34] ss:$8 sps:$4 sm:$0xff]   ;;  %v1054_v11 = vld [vmem:[#allocation9 + $0x30] ss:$8 sps:$4 sm:$0xff]  }
  0x58   :  { %287 = vmatpush1.bf16.msra.mxu0 %v1028_v18  ;;  %328 = vmatpush1.bf16.msra.mxu1 %v1029_v19  ;;  %v1059_v10 = vld [vmem:[#allocation9 + $0x134] ss:$8 sps:$4 sm:$0xff]   ;;  %v1057_v12 = vld [vmem:[#allocation9 + $0x130] ss:$8 sps:$4 sm:$0xff]   ;;  %v1062_v13 = vld [vmem:[#allocation9 + $0x44] ss:$8 sps:$4 sm:$0xff]  }
  0x59   :  { %288 = vmatprep.subr.bf16.mxu0 %v1030_v20  ;;  %329 = vmatprep.subr.bf16.mxu1 %v1032_v21  ;;  %v1065_v14 = vld [vmem:[#allocation9 + $0x144] ss:$8 sps:$4 sm:$0xff]   ;;  %v1060_v15 = vld [vmem:[#allocation9 + $0x40] ss:$8 sps:$4 sm:$0xff]   ;;  %v1068_v17 = vld [vmem:[#allocation9 + $0x54] ss:$8 sps:$4 sm:$0xff]  }
  0x5a   :  { %v1063_v16 = vld [vmem:[#allocation9 + $0x140] ss:$8 sps:$4 sm:$0xff]   ;;  %v1071_v18 = vld [vmem:[#allocation9 + $0x154] ss:$8 sps:$4 sm:$0xff]   ;;  %v1066_v19 = vld [vmem:[#allocation9 + $0x50] ss:$8 sps:$4 sm:$0xff]  }
  0x5b   :  { %v1069_v20 = vld [vmem:[#allocation9 + $0x150] ss:$8 sps:$4 sm:$0xff]   ;;  %v1074_v21 = vld [vmem:[#allocation9 + $0x64] ss:$8 sps:$4 sm:$0xff]   ;;  %v1083_v26 = vld [vmem:[#allocation9 + $0x174] ss:$8 sps:$4 sm:$0xff]  }
  0x5c   :  { %289 = vmatpush1.bf16.msra.mxu0 %v1034_v22  ;;  %330 = vmatpush1.bf16.msra.mxu1 %v1035_v23  ;;  %v1077_v22 = vld [vmem:[#allocation9 + $0x164] ss:$8 sps:$4 sm:$0xff]   ;;  %v1072_v23 = vld [vmem:[#allocation9 + $0x60] ss:$8 sps:$4 sm:$0xff]   ;;  %v1078_v30 = vld [vmem:[#allocation9 + $0x70] ss:$8 sps:$4 sm:$0xff]  }
  0x5d   :  { %768 = vmatprep.subr.bf16.mxu1 %v1038_v24  ;;  %809 = vmatprep.subr.bf16.mxu0 %v1041_v25  ;;  %v1075_v24 = vld [vmem:[#allocation9 + $0x160] ss:$8 sps:$4 sm:$0xff]   ;;  %v1080_v25 = vld [vmem:[#allocation9 + $0x74] ss:$8 sps:$4 sm:$0xff]   ;;  %v1098_v42 = vld [vmem:[#allocation9 + $0xa4] ss:$8 sps:$4 sm:$0xff]  }
  0x5e   :  { %v1092_v38 = vld [vmem:[#allocation9 + $0x94] ss:$8 sps:$4 sm:$0xff]  }
  0x5f   :  { %v1095_v39 = vld [vmem:[#allocation9 + $0x194] ss:$8 sps:$4 sm:$0xff]  }
  0x60   :  { %v1104_v46 = vld [vmem:[#allocation9 + $0xb4] ss:$8 sps:$4 sm:$0xff]  }
  0xcc   :  { %v90_v31 = vpop.permute.xlu0 %89  ;;  %v109_v33 = vpop.permute.xlu1 %108 }
  0xcd   :  { %v96_v43 = vmul.f32 %v95_v34, %v90_v31  ;;  %v115_v47 = vmul.f32 %v114_v37, %v109_v33  ;;  %v1081_v31 = vld [vmem:[#allocation9 + $0x170] ss:$8 sps:$4 sm:$0xff]   ;;  %v1086_v33 = vld [vmem:[#allocation9 + $0x84] ss:$8 sps:$4 sm:$0xff]   ;;  %v1087_v37 = vld [vmem:[#allocation9 + $0x180] ss:$8 sps:$4 sm:$0xff]  }
  0xce   :  { %v1089_v34 = vld [vmem:[#allocation9 + $0x184] ss:$8 sps:$4 sm:$0xff]  }
  0xd1   :  { %v99_v40 = vpop.permute.xlu0 %98  ;;  %v119_v41 = vpop.permute.xlu1 %118 }
  0xd2   :  { %v105_v44 = vmul.f32 %v104_v35, %v99_v40  ;;  %v125_v54 = vmul.f32 %v124_v45, %v119_v41  ;;  %v1084_v35 = vld [vmem:[#allocation9 + $0x80] ss:$8 sps:$4 sm:$0xff]   ;;  %v1090_v40 = vld [vmem:[#allocation9 + $0x90] ss:$8 sps:$4 sm:$0xff]  }
  0xd3   :  { %v1093_v41 = vld [vmem:[#allocation9 + $0x190] ss:$8 sps:$4 sm:$0xff]   ;;  %v1099_v45 = vld [vmem:[#allocation9 + $0x1a0] ss:$8 sps:$4 sm:$0xff]  }
  0xd4   :  { %v106_v48 = vadd.f32 %v105_v44, %v96_v43  ;;  %v1101_v43 = vld [vmem:[#allocation9 + $0x1a4] ss:$8 sps:$4 sm:$0xff]   ;;  %v1096_v44 = vld [vmem:[#allocation9 + $0xa0] ss:$8 sps:$4 sm:$0xff]  }
  0xd6   :  { %v116_v53 = vadd.f32 %v115_v47, %v106_v48  ;;  %v137_v55 = vpop.permute.xlu1 %136  ;;  %v151_v56 = vpop.permute.xlu0 %150  ;;  %v1107_v47 = vld [vmem:[#allocation9 + $0x1b4] ss:$8 sps:$4 sm:$0xff]   ;;  %v1102_v48 = vld [vmem:[#allocation9 + $0xb0] ss:$8 sps:$4 sm:$0xff]  }
  0xd7   :  { %vm138_vm2 = vcmp.eq.s32.totalorder %v137_v55, 1  ;;  %vm152_vm3 = vcmp.eq.s32.totalorder %v151_v56, 1  ;;  %v1119_v55 = vld [vmem:[#allocation9 + $0x1d4] ss:$8 sps:$4 sm:$0xff]   ;;  %v1114_v56 = vld [vmem:[#allocation9 + $0xd0] ss:$8 sps:$4 sm:$0xff]  }
  0xd8   :  { %v126_v57 = vadd.f32 %v125_v54, %v116_v53  ;;  %v147_v58 = vsel %vm138_vm2, %v142_v49, %v146_v50  ;;  %v1105_v49 = vld [vmem:[#allocation9 + $0x1b0] ss:$8 sps:$4 sm:$0xff]   ;;  %v1110_v50 = vld [vmem:[#allocation9 + $0xc4] ss:$8 sps:$4 sm:$0xff]   ;;  %v1111_v53 = vld [vmem:[#allocation9 + $0x1c0] ss:$8 sps:$4 sm:$0xff]  }
  0xd9   :  { %v157_v59 = vsel %vm152_vm3, %v156_v51, %v147_v58  ;;  %v1113_v51 = vld [vmem:[#allocation9 + $0x1c4] ss:$8 sps:$4 sm:$0xff]   ;;  %v1116_v54 = vld [vmem:[#allocation9 + $0xd4] ss:$8 sps:$4 sm:$0xff]  }
  0xda   :  { %v131_v60 = vadd.f32 %v130_v52, %v126_v57  ;;  %v1108_v52 = vld [vmem:[#allocation9 + $0xc0] ss:$8 sps:$4 sm:$0xff]   ;;  %v1117_v57 = vld [vmem:[#allocation9 + $0x1d0] ss:$8 sps:$4 sm:$0xff]   ;;  %v1122_v58 = vld [vmem:[#allocation9 + $0xe4] ss:$8 sps:$4 sm:$0xff]  }
  0xdc   :  { %v158_v61 = vadd.f32 %v157_v59, %v131_v60  ;;  %v1125_v59 = vld [vmem:[#allocation9 + $0x1e4] ss:$8 sps:$4 sm:$0xff]   ;;  %v1120_v60 = vld [vmem:[#allocation9 + $0xe0] ss:$8 sps:$4 sm:$0xff]  }
  0xde   :  { %v159_v0 = vpack.c.bf16 %v158_v61, %v158_v61  ;;  %v1123_v61 = vld [vmem:[#allocation9 + $0x1e0] ss:$8 sps:$4 sm:$0xff]  }
  0xe0   :  { %920 = vmatmul.mubr.msk.bf16.vlgmr.msra.gmra.mrb[0].mxu0 %vm278_vm4, %v159_v0  ;;  %921 = vmatmul.mubr.msk.bf16.vlgmr.msra.gmra.mrb[0].mxu1 %vm278_vm4, %v159_v0  ;;  %v1126_v0 = vld [vmem:[#allocation9 + $0xf0] ss:$8 sps:$4 sm:$0xff]  }
  0xe1   :  { %769 = vmatpush1.bf16.msra.mxu1 %v1036_v62  ;;  %810 = vmatpush1.bf16.msra.mxu0 %v1039_v63  ;;  %v1128_v62 = vld [vmem:[#allocation9 + $0xf4] ss:$8 sps:$4 sm:$0xff]  }
  0xe2   :  { %770 = vmatprep.subr.bf16.mxu1 %v1044_v1  ;;  %811 = vmatprep.subr.bf16.mxu0 %v1047_v2  ;;  %v1131_v63 = vld [vmem:[#allocation9 + $0x1f4] ss:$8 sps:$4 sm:$0xff]   ;;  %v1129_v1 = vld [vmem:[#allocation9 + $0x1f0] ss:$8 sps:$4 sm:$0xff]  }
  0xe3   :  { %v176_v2 = vld [vmem:[%s1422_s3] sm:$0xf] }
  0xe5   :  { %771 = vmatpush1.bf16.msra.mxu1 %v1042_v3  ;;  %812 = vmatpush1.bf16.msra.mxu0 %v1045_v4  ;;  %v181_v3 = vrot.slane %v176_v2, %v1365_v28  ;;  %v189_v4 = vrot.slane %v176_v2, %v113_v32 }
  0xe6   :  { %772 = vmatprep.subr.bf16.mxu1 %v1050_v5  ;;  %813 = vmatprep.subr.bf16.mxu0 %v1053_v6  ;;  %v185_v5 = vrot.slane %v176_v2, %v1368_v29  ;;  %v193_v6 = vrot.slane %v176_v2, %v123_v36 }
  0xe9   :  { %773 = vmatpush1.bf16.msra.mxu1 %v1048_v7  ;;  %814 = vmatpush1.bf16.msra.mxu0 %v1051_v8 }
  0xea   :  { %774 = vmatprep.subr.bf16.mxu1 %v1056_v9  ;;  %815 = vmatprep.subr.bf16.mxu0 %v1059_v10 }
  0xed   :  { %775 = vmatpush1.bf16.msra.mxu1 %v1054_v11  ;;  %816 = vmatpush1.bf16.msra.mxu0 %v1057_v12 }
  0xee   :  { %776 = vmatprep.subr.bf16.mxu1 %v1062_v13  ;;  %817 = vmatprep.subr.bf16.mxu0 %v1065_v14 }
  0xf1   :  { %777 = vmatpush1.bf16.msra.mxu1 %v1060_v15  ;;  %818 = vmatpush1.bf16.msra.mxu0 %v1063_v16 }
  0xf2   :  { %778 = vmatprep.subr.bf16.mxu1 %v1068_v17  ;;  %819 = vmatprep.subr.bf16.mxu0 %v1071_v18 }
  0xf5   :  { %779 = vmatpush1.bf16.msra.mxu1 %v1066_v19  ;;  %820 = vmatpush1.bf16.msra.mxu0 %v1069_v20 }
  0xf6   :  { %780 = vmatprep.subr.bf16.mxu1 %v1074_v21  ;;  %821 = vmatprep.subr.bf16.mxu0 %v1077_v22 }
  0xf9   :  { %781 = vmatpush1.bf16.msra.mxu1 %v1072_v23  ;;  %822 = vmatpush1.bf16.msra.mxu0 %v1075_v24  ;;  %v436_v24 = vld [vmem:[%s1424_s5] sm:$0x3]  ;;  %s1263_s5 = smov [#allocation11]  }
  0xfa   :  { %782 = vmatprep.subr.bf16.mxu1 %v1080_v25  ;;  %823 = vmatprep.subr.bf16.mxu0 %v1083_v26  ;;  %v441_v25 = vrot.slane %v436_v24, %v1365_v28  ;;  %v445_v26 = vrot.slane %v436_v24, %v1368_v29 }
  0xfd   :  { %783 = vmatpush1.bf16.msra.mxu1 %v1078_v30  ;;  %824 = vmatpush1.bf16.msra.mxu0 %v1081_v31 }
  0xfe   :  { %784 = vmatprep.subr.bf16.mxu1 %v1086_v33  ;;  %825 = vmatprep.subr.bf16.mxu0 %v1089_v34  ;;  %v861_v33 = vld [vmem:[%s1425_s6] sm:$0x3]  ;;  %s891_s6 = sshll.u32 %s1263_s5, 4  ;;  %s892_s6 = int_to_ptr.vmem [resolvable:$true] %s891_s6 }
  0xff   :  { %s1220_s20 = scalar_lea.vmem %s892_s6, 128  ;;  %p1225_p5 = scmp.lt.s32.totalorder %s892_s6, %s892_s6 }
 0x100   :  { %p1221_p4 = scmp.ne.s32.totalorder %s892_s6, %s1220_s20  ;;  %p1226_p6 = scmp.lt.s32.totalorder %s1220_s20, %s1220_s20 }
 0x101   :  { %785 = vmatpush1.bf16.msra.mxu1 %v1084_v35  ;;  %826 = vmatpush1.bf16.msra.mxu0 %v1087_v37 }
 0x102   :  { %786 = vmatprep.subr.bf16.mxu1 %v1092_v38  ;;  %827 = vmatprep.subr.bf16.mxu0 %v1095_v39  ;;  %p1227_p7 = por %p1226_p6, %p1225_p5 }
 0x104   :  { %p1228_p8 = pnand %p1227_p7, %p1221_p4 }
 0x105   :  { %787 = vmatpush1.bf16.msra.mxu1 %v1090_v40  ;;  %828 = vmatpush1.bf16.msra.mxu0 %v1093_v41 }
 0x106   :  { %788 = vmatprep.subr.bf16.mxu1 %v1098_v42  ;;  %829 = vmatprep.subr.bf16.mxu0 %v1101_v43  ;;  %v866_v42 = vrot.slane %v861_v33, %v1365_v28 }
 0x109   :  { %789 = vmatpush1.bf16.msra.mxu1 %v1096_v44  ;;  %830 = vmatpush1.bf16.msra.mxu0 %v1099_v45 }
 0x10a   :  { %790 = vmatprep.subr.bf16.mxu1 %v1104_v46  ;;  %831 = vmatprep.subr.bf16.mxu0 %v1107_v47  ;;  %v870_v46 = vrot.slane %v861_v33, %v1368_v29 }
 0x10d   :  { %791 = vmatpush1.bf16.msra.mxu1 %v1102_v48  ;;  %832 = vmatpush1.bf16.msra.mxu0 %v1105_v49 }
 0x10e   :  { %792 = vmatprep.subr.bf16.mxu1 %v1110_v50  ;;  %833 = vmatprep.subr.bf16.mxu0 %v1113_v51 }
 0x111   :  { %793 = vmatpush1.bf16.msra.mxu1 %v1108_v52  ;;  %834 = vmatpush1.bf16.msra.mxu0 %v1111_v53 }
 0x112   :  { %794 = vmatprep.subr.bf16.mxu1 %v1116_v54  ;;  %835 = vmatprep.subr.bf16.mxu0 %v1119_v55 }
 0x115   :  { %795 = vmatpush1.bf16.msra.mxu1 %v1114_v56  ;;  %836 = vmatpush1.bf16.msra.mxu0 %v1117_v57 }
 0x116   :  { %796 = vmatprep.subr.bf16.mxu1 %v1122_v58  ;;  %837 = vmatprep.subr.bf16.mxu0 %v1125_v59 }
 0x119   :  { %797 = vmatpush1.bf16.msra.mxu1 %v1120_v60  ;;  %838 = vmatpush1.bf16.msra.mxu0 %v1123_v61 }
 0x11a   :  { %798 = vmatprep.subr.bf16.mxu1 %v1128_v62  ;;  %839 = vmatprep.subr.bf16.mxu0 %v1131_v63 }
 0x11d   :  { %799 = vmatpush1.bf16.msra.mxu1 %v1126_v0  ;;  %840 = vmatpush1.bf16.msra.mxu0 %v1129_v1 }
 0x1b3   :  { %v316_v7 = vpop.f32.mrb[0].mxu0  ;;  %v357_v8 = vpop.f32.mrb[0].mxu1 }
 0x1b4   :  { %v317_v9 = vadd.f32 %v316_v7, %v181_v3  ;;  %v358_v10 = vadd.f32 %v357_v8, %v189_v4  ;;  %v318_v11 = vpop.f32.mrb[1].mxu0  ;;  %v359_v12 = vpop.f32.mrb[1].mxu1 }
 0x1b5   :  { %v319_v13 = vadd.f32 %v318_v11, %v185_v5  ;;  %v360_v14 = vadd.f32 %v359_v12, %v193_v6  ;;  %v320_v15 = vpop.f32.mrb[2].mxu0  ;;  %v361_v16 = vpop.f32.mrb[2].mxu1 }
 0x1b6   :  { %v364_v17 = vmax.f32 %v317_v9, 0.0  ;;  %v366_v18 = vmax.f32 %v358_v10, 0.0  ;;  %v321_v19 = vpop.f32.mrb[3].mxu0  ;;  %v362_v20 = vpop.f32.mrb[3].mxu1 }
 0x1b7   :  { %v365_v32 = vmax.f32 %v319_v13, 0.0  ;;  %v367_v21 = vmax.f32 %v360_v14, 0.0 }
 0x1b8   :  { %v368_v27 = vpack.c.bf16 %v364_v17, %v364_v17  ;;  %v370_v36 = vpack.c.bf16 %v366_v18, %v366_v18 }
 0x1b9   :  { %v369_v22 = vpack.c.bf16 %v365_v32, %v365_v32  ;;  %v371_v23 = vpack.c.bf16 %v367_v21, %v367_v21 }
 0x1bb   :  { %800 = vmatprep.mubr.bf16.mxu1 %v369_v22  ;;  %841 = vmatprep.mubr.bf16.mxu0 %v371_v23 }
 0x1bc   :  { %801 = vmatmul.mubr.bf16.vlgmr.msra.gmra.mrb[4].mxu1 %v368_v27  ;;  %842 = vmatmul.mubr.bf16.vlgmr.msra.gmra.mrb[4].mxu0 %v370_v36 }
 0x28f   :  { %v802_v30 = vpop.f32.mrb[4].mxu1  ;;  %v843_v31 = vpop.f32.mrb[4].mxu0 }
 0x290   :  { %v803_v34 = vadd.f32 %v802_v30, %v441_v25  ;;  %v804_v35 = vpop.f32.mrb[5].mxu1  ;;  %v845_v37 = vpop.f32.mrb[5].mxu0 }
 0x291   :  { %v805_v38 = vadd.f32 %v804_v35, %v445_v26  ;;  %v806_v39 = vpop.f32.mrb[6].mxu1  ;;  %v847_v40 = vpop.f32.mrb[6].mxu0 }
 0x292   :  { %v844_v41 = vadd.f32 %v843_v31, %v803_v34  ;;  %v807_v43 = vpop.f32.mrb[7].mxu1  ;;  %v848_v44 = vpop.f32.mrb[7].mxu0 }
 0x293   :  { %v846_v45 = vadd.f32 %v845_v37, %v805_v38 }
 0x294   :  { %v850_v47 = vmax.f32 %v844_v41, 0.0 }
 0x295   :  { %v851_v48 = vmax.f32 %v846_v45, 0.0 }
 0x296   :  { %v873_v49 = vmul.f32 %v866_v42, %v850_v47 }
 0x297   :  { %v987_v50 = vpack.c.bf16 %v851_v48, %v850_v47  ;;  %v874_v51 = vmul.f32 %v870_v46, %v851_v48 }
 0x299   :  { %860 = vst [vmem:[#allocation11] sm:$0xff] %v987_v50  ;;  %v875_v52 = vadd.f32 %v874_v51, %v873_v49 }
 0x29b   :  { %876 = vadd.xlane.f32.xlu1 %v875_v52 }
 0x29c   :  { %1231 = shalt.err (!%p1228_p8)
}
 0x29d   :  { %s1232_s12 = scalar_lea.hbm %s1428_s9, 128 }
 0x29e   :  { %p1233_p9 = scmp.ne.s32.totalorder %s1428_s9, %s1232_s12  ;;  %p1236_p10 = scmp.lt.u32.totalorder %s1232_s12, %s1428_s9 }
 0x2a0   :  { %p1238_p11 = pnand %p1236_p10, %p1233_p9 }
 0x2a2   :  { %1241 = shalt.err (!%p1238_p11)
}
 0x2a3   :  { %894 = dma.vmem_to_hbm [thread:$0]  %s892_s6, 128, %s1428_s9, [#allocation5]   ;;  %v879_v28 = vstv %s1426_s7  ;;  %vm881_vm5 = vcmask 7168  }
 0x328   :  { %v877_v29 = vpop.xlane.xlu1 %876 }
 0x329   :  { %v880_v53 = vadd.f32 %v879_v28, %v877_v29 }
 0x32b   :  { %882 = vst.msk [vmem:[%s1427_s8] sm:$0xff] %vm881_vm5, %v880_v53 }
 0x32c   :  { %1248 = dma.done.wait [#allocation5], 128  }
 0x32d   :  { %1249 = vsyncadd [#allocation5], 4294967168 }
 0x32e   :  { %900 = vsyncpa [#allocation4], 1 }
 0x32f   :  { %901 = vsyncpa [#allocation7], 1 }
 0x330   :  { %902 = vsyncpa [#allocation10], 1 }
 0x331   :  { %903 = vsyncpa [#allocation5], 1 }

</bundles_post_ra>
